<compile_context>
chip_gen: v7x
topology: tpu7x:2x2x1
jax: 0.10.0
libtpu: 0.0.40
codegen_flags: <defaults>
</compile_context>

<pallas_src>
import jax
import jax.numpy as jnp
from jax.experimental import pallas as pl
from jax.experimental.pallas import tpu as pltpu


def _make_attention_kernel(tb, K, A, masked):
    """Build a kernel that processes `tb` batch elements per grid step."""

    def kernel(*refs):
        if masked:
            x_ref, wht_ref, bh_ref, v_ref, m_ref, o_ref = refs
        else:
            x_ref, wht_ref, bh_ref, v_ref, o_ref = refs

        # x_ref block is the pre-flattened (tb*K, D) slab for this batch tile.
        x = x_ref[...]                                       # (tb*K, D)
        h = jnp.tanh(
            jnp.dot(x, wht_ref[...], preferred_element_type=jnp.float32)
            + bh_ref[...]
        )                                                    # (tb*K, A) f32

        # Scores e[b, k] = sum_a h[b*K + k, a] * v[a]  -> (tb, K), keys on
        # lanes so the softmax/mask/renorm below are lane-axis reductions.
        # (A second MXU dot + einshape relayout is a bundle-verified follow-up
        # if this reduce shows a VMEM relayout; secondary at these sizes.)
        he = h * v_ref[...]                                  # (tb*K, A)
        e = jnp.sum(he.reshape(tb, K, A), axis=-1)           # (tb, K)

        # Softmax over keys (lane axis), fused with post-softmax masking:
        #   ref: d = p/S ; d *= mask ; d /= (sum(d) + 1e-13)
        #   ==>  out = p*mask / (sum(p*mask) + 1e-13 * S)
        e_max = jnp.max(e, axis=-1, keepdims=True)
        p = jnp.exp(e - e_max)                               # (tb, K)
        s = jnp.sum(p, axis=-1, keepdims=True)               # (tb, 1)
        if masked:
            pm = p * m_ref[...]
            denom = jnp.sum(pm, axis=-1, keepdims=True) + 1e-13 * s
        else:
            pm = p
            denom = s + 1e-13 * s
        # Exact divide (NOT pl.reciprocal(approx=True): its ~2^-12 relative
        # error exceeded the 2e-5 reference tolerance).
        o_ref[...] = (pm / denom).astype(o_ref.dtype)

    return kernel


def _pick_batch_tile(B, K, D, A, x_elem_bytes, batch_tile):
    """Pick how many batch elements to process per grid step."""
    if batch_tile is not None:
        tb = max(1, int(batch_tile))
    else:
        # The kernel is HBM-streaming bound on x.  Target a ~4 MiB x block so
        # the fixed ~0.35us per-grid-step overhead is amortized, while keeping
        # (double-buffered x block) + (f32 temporaries h/he/p/out) under a
        # ~24 MiB VMEM budget (safe with vmem_limit_bytes=32 MiB on all gens).
        per_elem_x = K * D * x_elem_bytes
        per_elem_tmp = 4 * K * A * 4            # h, he, exp, misc f32 temps
        per_elem_vmem = 2 * per_elem_x + per_elem_tmp + 4 * K * 4
        target_x_bytes = 4 * 1024 * 1024
        vmem_budget = 24 * 1024 * 1024
        tb = max(1, target_x_bytes // max(per_elem_x, 1))
        tb = min(tb, max(1, vmem_budget // max(per_elem_vmem, 1)))

    # Keep >= 2 grid steps when the batch allows it so v7x's two TensorCores
    # both get work under dimension_semantics=("parallel",).
    if B > 8:
        tb = min(tb, (B + 1) // 2)

    if tb >= B:
        return B
    # When tiling the batch, keep the sublane dim of the 2-D mask/output
    # blocks a multiple of 8 (layout-friendly, satisfies the (8,128) rule).
    tb = max(8, (tb // 8) * 8)
    return B if tb >= B else tb


def attention_forward(x, w_h, b_h, v, mask=None, *, batch_tile=None,
                      ingest_dtype=None):
    """x: [B, K, D], w_h: [A, D], b_h: [A], v: [1, A], mask: [B, K, 1] or None.

    Returns attn_dist with shape [B, K, 1] (matches the PyTorch module).
    Set ingest_dtype=jnp.bfloat16 to halve HBM traffic on x / W_h (matmul in
    bf16 with f32 accumulation; all other math stays f32).
    """
    B, K, D = x.shape
    A = w_h.shape[0]
    out_dtype = x.dtype

    x_dtype = jnp.dtype(ingest_dtype) if ingest_dtype is not None else jnp.dtype(x.dtype)

    # Pre-flatten x so the kernel's first matmul needs no in-kernel reshape.
    xf = x.reshape(B * K, D).astype(x_dtype)

    # Pre-transpose / reshape the tiny parameters once in the wrapper so the
    # kernel body contains no transposes (no XLU traffic on the hot path).
    w_ht = jnp.asarray(w_h, dtype=jnp.float32).T.astype(x_dtype)   # (D, A)
    b_h2 = jnp.asarray(b_h, dtype=jnp.float32).reshape(1, A)
    v2 = jnp.asarray(v, dtype=jnp.float32).reshape(1, A)

    tb = _pick_batch_tile(B, K, D, A, x_dtype.itemsize, batch_tile)
    # Partial last block handled by Pallas (masked writeback); no wrapper pad.
    grid = (pl.cdiv(B, tb),)

    in_specs = [
        pl.BlockSpec((tb * K, D), lambda i: (i, 0)),   # x batch tile (flat)
        pl.BlockSpec((D, A), lambda i: (0, 0)),        # W_h^T (replicated)
        pl.BlockSpec((1, A), lambda i: (0, 0)),        # b_h
        pl.BlockSpec((1, A), lambda i: (0, 0)),        # attn_v
    ]
    args = [xf, w_ht, b_h2, v2]

    masked = mask is not None
    if masked:
        m2 = jnp.asarray(mask, dtype=jnp.float32).reshape(B, K)
        in_specs.append(pl.BlockSpec((tb, K), lambda i: (i, 0)))
        args.append(m2)

    out = pl.pallas_call(
        _make_attention_kernel(tb, K, A, masked),
        out_shape=jax.ShapeDtypeStruct((B, K), out_dtype),  # lane-dense output
        grid=grid,
        in_specs=in_specs,
        out_specs=pl.BlockSpec((tb, K), lambda i: (i, 0)),
        compiler_params=pltpu.CompilerParams(
            dimension_semantics=("parallel",),
            vmem_limit_bytes=32 * 1024 * 1024,
        ),
    )(*args)

    return out.reshape(B, K, 1)


def attention_ref(x, w_h, b_h, v, mask=None):
    """Pure-JAX reference matching the PyTorch forward exactly."""
    h = jnp.tanh(jnp.einsum("bkd,ad->bka", x, w_h) + b_h)
    e = jnp.einsum("bka,oa->bko", h, v)                     # (B, K, 1)
    d = jax.nn.softmax(e, axis=-2)
    if mask is not None:
        d = d * mask
    s = jnp.sum(d, axis=-2, keepdims=True) + 1e-13
    return d / s


if __name__ == "__main__":
    B, K, D, A = 2, 8, 32, 16   # batch, num_keys, input_dim, attn_size

    key = jax.random.PRNGKey(0)
    kx, kw, kb, kv, km = jax.random.split(key, 5)

    x = jax.random.normal(kx, (B, K, D), dtype=jnp.float32)
    # Deterministic "Linear" parameter init (synthetic, not a checkpoint).
    w_h = jax.random.normal(kw, (A, D), dtype=jnp.float32) * 0.1
    b_h = jax.random.normal(kb, (A,), dtype=jnp.float32) * 0.1
    v = jax.random.normal(kv, (1, A), dtype=jnp.float32) * 0.1
    # Mask: 0/1 per key, keep at least the first key valid per batch.
    mask = (jax.random.uniform(km, (B, K, 1)) > 0.3).astype(jnp.float32)
    mask = mask.at[:, 0, :].set(1.0)

    # Masked path (f32).
    out = jax.block_until_ready(attention_forward(x, w_h, b_h, v, mask))
    ref = attention_ref(x, w_h, b_h, v, mask)
    assert out.shape == (B, K, 1)
    assert jnp.allclose(out, ref, atol=2e-5, rtol=2e-5), (
        f"max abs err {jnp.max(jnp.abs(out - ref))}"
    )

    # mask=None path (separate kernel variant, no mask DMA).
    out_nm = jax.block_until_ready(attention_forward(x, w_h, b_h, v, None))
    ref_nm = attention_ref(x, w_h, b_h, v, None)
    assert jnp.allclose(out_nm, ref_nm, atol=2e-5, rtol=2e-5), (
        f"max abs err {jnp.max(jnp.abs(out_nm - ref_nm))}"
    )

    # Batch-tiled path: B larger than the tile, partial last block (no pad).
    B2 = 20
    x2 = jax.random.normal(kx, (B2, K, D), dtype=jnp.float32)
    mask2 = (jax.random.uniform(km, (B2, K, 1)) > 0.3).astype(jnp.float32)
    mask2 = mask2.at[:, 0, :].set(1.0)
    out2 = jax.block_until_ready(
        attention_forward(x2, w_h, b_h, v, mask2, batch_tile=8)
    )
    ref2 = attention_ref(x2, w_h, b_h, v, mask2)
    assert out2.shape == (B2, K, 1)
    assert jnp.allclose(out2, ref2, atol=2e-5, rtol=2e-5), (
        f"max abs err {jnp.max(jnp.abs(out2 - ref2))}"
    )

    # bf16-ingest path (memory-bound optimization); looser tolerance vs f32 ref.
    out_bf = jax.block_until_ready(
        attention_forward(x2, w_h, b_h, v, mask2, batch_tile=8,
                          ingest_dtype=jnp.bfloat16)
    )
    assert jnp.allclose(out_bf, ref2, atol=5e-2, rtol=5e-2), (
        f"bf16 max abs err {jnp.max(jnp.abs(out_bf - ref2))}"
    )

    print("KERNEL_OK")
</pallas_src>

<mosaic_0001>
module attributes {stable_mosaic.version = 11 : i64} {
  func.func @kernel(%arg0: i32, %arg1: memref<16x32xf32, #tpu.memory_space<vmem>>, %arg2: memref<32x16xf32, #tpu.memory_space<vmem>>, %arg3: memref<1x16xf32, #tpu.memory_space<vmem>>, %arg4: memref<1x16xf32, #tpu.memory_space<vmem>>, %arg5: memref<2x8xf32, #tpu.memory_space<vmem>>, %arg6: memref<2x8xf32, #tpu.memory_space<vmem>>) attributes {dimension_semantics = [#tpu.dimension_semantics<parallel>], iteration_bounds = array<i64: 1>, scalar_prefetch = 0 : i64, scratch_operands = 0 : i64, tpu.core_type = #tpu.core_type<tc>, window_params = [{transform_indices = @transform_0, window_bounds = array<i64: 16, 32>}, {pipeline_mode = #tpu.pipeline_mode<synchronous>, transform_indices = @transform_1, window_bounds = array<i64: 32, 16>}, {pipeline_mode = #tpu.pipeline_mode<synchronous>, transform_indices = @transform_2, window_bounds = array<i64: 1, 16>}, {pipeline_mode = #tpu.pipeline_mode<synchronous>, transform_indices = @transform_3, window_bounds = array<i64: 1, 16>}, {transform_indices = @transform_4, window_bounds = array<i64: 2, 8>}, {transform_indices = @transform_5, window_bounds = array<i64: 2, 8>}]} {
    %c0 = arith.constant 0 : index
    %c0_0 = arith.constant 0 : index
    %0 = vector.load %arg1[%c0, %c0_0] : memref<16x32xf32, #tpu.memory_space<vmem>>, vector<16x32xf32>
    %c0_1 = arith.constant 0 : index
    %c0_2 = arith.constant 0 : index
    %1 = vector.load %arg2[%c0_1, %c0_2] : memref<32x16xf32, #tpu.memory_space<vmem>>, vector<32x16xf32>
    %cst = arith.constant dense<0.000000e+00> : vector<16x16xf32>
    %2 = tpu.matmul %0, %1, %cst {dimension_numbers = #tpu.dot_dimension_numbers<[1], [0], [0], [1], [0, 0, 1, 1], [], []>} : vector<16x32xf32>, vector<32x16xf32>, vector<16x16xf32> -> vector<16x16xf32>
    %c0_3 = arith.constant 0 : index
    %c0_4 = arith.constant 0 : index
    %3 = vector.load %arg3[%c0_3, %c0_4] : memref<1x16xf32, #tpu.memory_space<vmem>>, vector<1x16xf32>
    %4 = vector.broadcast %3 : vector<1x16xf32> to vector<16x16xf32>
    %5 = arith.addf %2, %4 : vector<16x16xf32>
    %6 = math.tanh %5 : vector<16x16xf32>
    %c0_5 = arith.constant 0 : index
    %c0_6 = arith.constant 0 : index
    %7 = vector.load %arg4[%c0_5, %c0_6] : memref<1x16xf32, #tpu.memory_space<vmem>>, vector<1x16xf32>
    %8 = vector.broadcast %7 : vector<1x16xf32> to vector<16x16xf32>
    %9 = arith.mulf %6, %8 : vector<16x16xf32>
    %10 = vector.shape_cast %9 : vector<16x16xf32> to vector<2x8x16xf32>
    %cst_7 = arith.constant dense<0.000000e+00> : vector<2x8xf32>
    %11 = vector.multi_reduction <add>, %10, %cst_7 [2] : vector<2x8x16xf32> to vector<2x8xf32>
    %cst_8 = arith.constant dense<0xFF800000> : vector<2xf32>
    %12 = vector.multi_reduction <maximumf>, %11, %cst_8 [1] : vector<2x8xf32> to vector<2xf32>
    %13 = vector.shape_cast %12 : vector<2xf32> to vector<2x1xf32>
    %14 = vector.broadcast %13 : vector<2x1xf32> to vector<2x8xf32>
    %15 = arith.subf %11, %14 : vector<2x8xf32>
    %16 = math.exp %15 : vector<2x8xf32>
    %cst_9 = arith.constant dense<0.000000e+00> : vector<2xf32>
    %17 = vector.multi_reduction <add>, %16, %cst_9 [1] : vector<2x8xf32> to vector<2xf32>
    %18 = vector.shape_cast %17 : vector<2xf32> to vector<2x1xf32>
    %c0_10 = arith.constant 0 : index
    %c0_11 = arith.constant 0 : index
    %19 = vector.load %arg5[%c0_10, %c0_11] : memref<2x8xf32, #tpu.memory_space<vmem>>, vector<2x8xf32>
    %20 = arith.mulf %16, %19 : vector<2x8xf32>
    %cst_12 = arith.constant dense<0.000000e+00> : vector<2xf32>
    %21 = vector.multi_reduction <add>, %20, %cst_12 [1] : vector<2x8xf32> to vector<2xf32>
    %22 = vector.shape_cast %21 : vector<2xf32> to vector<2x1xf32>
    %cst_13 = arith.constant 9.99999982E-14 : f32
    %23 = vector.broadcast %cst_13 : f32 to vector<2x1xf32>
    %24 = arith.mulf %23, %18 : vector<2x1xf32>
    %25 = arith.addf %22, %24 : vector<2x1xf32>
    %26 = vector.broadcast %25 : vector<2x1xf32> to vector<2x8xf32>
    %27 = arith.divf %20, %26 : vector<2x8xf32>
    %c0_14 = arith.constant 0 : index
    %c0_15 = arith.constant 0 : index
    %28 = vector.load %arg6[%c0_14, %c0_15] : memref<2x8xf32, #tpu.memory_space<vmem>>, vector<2x8xf32>
    tpu.vector_store %arg6[%c0_14, %c0_15], %27 {strides = array<i32>} : memref<2x8xf32, #tpu.memory_space<vmem>>, vector<2x8xf32>,
    return
  }
  func.func @transform_0(%arg0: i32) -> (i32, i32) {
    %c0_i32 = arith.constant 0 : i32
    %c0_i32_0 = arith.constant 0 : i32
    return %arg0, %c0_i32 : i32, i32
  }
  func.func @transform_1(%arg0: i32) -> (i32, i32) {
    %c0_i32 = arith.constant 0 : i32
    %c0_i32_0 = arith.constant 0 : i32
    %c0_i32_1 = arith.constant 0 : i32
    return %c0_i32, %c0_i32_0 : i32, i32
  }
  func.func @transform_2(%arg0: i32) -> (i32, i32) {
    %c0_i32 = arith.constant 0 : i32
    %c0_i32_0 = arith.constant 0 : i32
    %c0_i32_1 = arith.constant 0 : i32
    return %c0_i32, %c0_i32_0 : i32, i32
  }
  func.func @transform_3(%arg0: i32) -> (i32, i32) {
    %c0_i32 = arith.constant 0 : i32
    %c0_i32_0 = arith.constant 0 : i32
    %c0_i32_1 = arith.constant 0 : i32
    return %c0_i32, %c0_i32_0 : i32, i32
  }
  func.func @transform_4(%arg0: i32) -> (i32, i32) {
    %c0_i32 = arith.constant 0 : i32
    %c0_i32_0 = arith.constant 0 : i32
    return %arg0, %c0_i32 : i32, i32
  }
  func.func @transform_5(%arg0: i32) -> (i32, i32) {
    %c0_i32 = arith.constant 0 : i32
    %c0_i32_0 = arith.constant 0 : i32
    return %arg0, %c0_i32 : i32, i32
  }
}

</mosaic_0001>

<bundles_post_ra>
// kernel: tpu_custom_call.1
= control target key start
LH: loop header
LB: loop body
LE: loop exit
PB: predicated region body
PF: predicated region fallthrough
CT: control target
= control target key end

     0   :  { %vm34_vm0 = vcmask 261120   ;;  %s440_s0 = inlined_call_operand.vmem [shape: f32[16,32], index: 0, kind: input, shape index: {}]   ;;  %s441_s1 = inlined_call_operand.vmem [shape: f32[32,16], index: 1, kind: input, shape index: {}]   ;;  %s442_s2 = inlined_call_operand.vmem [shape: f32[1,16], index: 2, kind: input, shape index: {}]   ;;  %s443_s3 = inlined_call_operand.vmem [shape: f32[1,16], index: 3, kind: input, shape index: {}]   ;;  %s444_s4 = inlined_call_operand.vmem [shape: f32[2,8], index: 4, kind: input, shape index: {}]   ;;  %s445_s5 = inlined_call_operand.hbm [shape: f32[2,8], index: 5, kind: output, shape index: {}]  }
   0x1   :  { %v23_v0 = vld [vmem:[%s441_s1] sm:$0xff]  ;;  %v24_v1 = vld [vmem:[%s441_s1 + $0x8] sm:$0xff]  ;;  %v25_v2 = vld [vmem:[%s441_s1 + $0x10] sm:$0xff] }
   0x2   :  { %v303_v3 = vpack.c.bf16 %v24_v1, %v23_v0  ;;  %v26_v4 = vld [vmem:[%s441_s1 + $0x18] sm:$0xff]  ;;  %v21_v5 = vld [vmem:[%s440_s0] sm:$0xff] }
   0x3   :  { %v307_v6 = vpack.c.bf16 %v26_v4, %v25_v2  ;;  %300 = vmatprep.mubr.msk.f32.mxu0 %vm34_vm0, %v21_v5 }
   0x4   :  { %10 = vsyncpa [#allocation3], 0  ;;  %304 = vmatprep.subr.bf16.mxu0 %v303_v3  ;;  %v22_v7 = vld [vmem:[%s440_s0 + $0x8] sm:$0xff]  ;;  %v282_v8 = vld [vmem:[%s442_s2] ss:$0 sm:$0xff]  ;;  %vm127_vm1 = vcmask 130048   ;;  %v136_v20 = vlaneseq }
   0x5   :  { %306 = vmatpush3.bf16.msra.mxu0 %v303_v3  ;;  %v285_v13 = vld [vmem:[%s443_s3] ss:$0 sm:$0xff]  ;;  %vm146_vm2 = vcmask 1041409   ;;  %vm149_vm3 = vcmask 58368   ;;  %v351_v35 = vmov 0   ;;  %s352_s3 = smov [#allocation2]  }
   0x6   :  { %308 = vmatprep.subr.bf16.mxu0 %v307_v6  ;;  %v139_v21 = vshrl.u32 %v136_v20, 7  ;;  %v191_v23 = vld [vmem:[%s444_s4] sm:$0x3]  ;;  %v137_v25 = vand.u32 127, %v136_v20  ;;  %313 = vset.pattern.permute.xlu1 %v351_v35  ;;  %s274_s4 = sshll.u32 %s352_s3, 4  ;;  %s275_s4 = int_to_ptr.vmem [resolvable:$true] %s274_s4 }
   0x7   :  { %314 = vset.pattern.permute.xlu0 %v351_v35  ;;  %s327_s8 = scalar_lea.vmem %s275_s4, 32  ;;  %p332_p1 = scmp.lt.s32.totalorder %s275_s4, %s275_s4 }
   0x8   :  { %v160_v22 = vsub.s32 1, %v139_v21  ;;  %v410_v27 = vsub.s32 %v137_v25, %v139_v21  ;;  %v156_v33 = vsub.s32 0, %v139_v21  ;;  %p328_p0 = scmp.ne.s32.totalorder %s275_s4, %s327_s8  ;;  %p333_p2 = scmp.lt.s32.totalorder %s327_s8, %s327_s8 }
   0x9   :  { %310 = vmatpush3.bf16.msra.mxu0 %v307_v6 }
   0xa   :  { %v203_v24 = vrot.slane %v191_v23, %v160_v22  ;;  %v196_v34 = vrot.slane %v191_v23, %v156_v33  ;;  %p334_p3 = por %p333_p2, %p332_p1 }
   0xc   :  { %301 = vmatmul.mubr.msk.f32.vlgmr.msra.gmra.mrb[0].mxu0 %vm34_vm0, %v22_v7  ;;  %p335_p4 = pnand %p334_p3, %p328_p0 }
  0xdf   :  { %v302_v9 = vpop.f32.mrb[0].mxu0 }
  0xe0   :  { %v113_v10 = vadd.f32 %v302_v9, %v282_v8  ;;  %v107_v11 = vpop.f32.mrb[1].mxu0 }
  0xe1   :  { %v108_v12 = vadd.f32 %v282_v8, %v107_v11 }
  0xe2   :  { %315 = vtanh.f32 %v113_v10 }
  0xe3   :  { %317 = vtanh.f32 %v108_v12 }
  0xec   :  { %v316_v14 = vpop.eup %315 }
  0xed   :  { %v318_v15 = vpop.eup %317  ;;  %v126_v18 = vmul.f32 %v316_v14, %v285_v13 }
  0xee   :  { %v125_v16 = vmul.f32 %v318_v15, %v285_v13 }
  0xef   :  { %v131_v19 = vsel %vm127_vm1, %v126_v18, 0.0 }
  0xf0   :  { %v128_v17 = vsel %vm127_vm1, %v125_v16, 0.0 }
  0xf1   :  { %129 = vadd.xlane.f32.xlu0 %v128_v17 }
  0xf5   :  { %132 = vadd.xlane.f32.xlu0 %v131_v19 }
 0x10b   :  { %205 = vbcast.lane.b32.xlu0 %v203_v24, 256 }
 0x17e   :  { %v130_v26 = vpop.xlane.xlu0 %129 }
 0x17f   :  { %v141_v29 = vrot.slane %v130_v26, %v410_v27 }
 0x182   :  { %v133_v28 = vpop.xlane.xlu0 %132 }
 0x183   :  { %v145_v30 = vrot.slane %v133_v28, %v410_v27 }
 0x185   :  { %v147_v31 = vsel %vm146_vm2, %v145_v30, %v141_v29 }
 0x186   :  { %v150_v32 = vsel %vm149_vm3, %v147_v31, -inf  ;;  %v206_v43 = vpop.permute.xlu0 %205 }
 0x187   :  { %151 = vmax.xlane.f32.xlu1 %v150_v32 }
 0x198   :  { %198 = vbcast.lane.b32.xlu1 %v196_v34, 256 }
 0x214   :  { %v152_v36 = vpop.xlane.xlu1 %151 }
 0x215   :  { %v157_v37 = vrot.slane %v152_v36, %v156_v33  ;;  %v161_v38 = vrot.slane %v152_v36, %v160_v22 }
 0x217   :  { %v164_v39 = vsub.f32 %v130_v26, %v157_v37  ;;  %v165_v40 = vsub.f32 %v133_v28, %v161_v38 }
 0x218   :  { %v199_v47 = vpop.permute.xlu1 %198 }
 0x219   :  { %v166_v41 = vmul.f32 1.442695, %v164_v39  ;;  %v168_v42 = vmul.f32 1.442695, %v165_v40 }
 0x21b   :  { %319 = vpow2.f32 %v166_v41 }
 0x21c   :  { %321 = vpow2.f32 %v168_v42 }
 0x225   :  { %v320_v44 = vpop.eup %319 }
 0x226   :  { %v322_v45 = vpop.eup %321  ;;  %173 = vperm.xlu1 %313, %v320_v44   ;;  %v209_v48 = vmul.f32 %v320_v44, %v199_v47 }
 0x227   :  { %v210_v46 = vmul.f32 %v322_v45, %v206_v43 }
 0x229   :  { %217 = vperm.xlu0 %314, %v210_v46  }
 0x22a   :  { %176 = vperm.xlu1 %313, %v322_v45  }
 0x22e   :  { %214 = vperm.xlu1 %313, %v209_v48  }
 0x2a5   :  { %v174_v49 = vpop.permute.xlu1 %173 }
 0x2a6   :  { %v181_v51 = vrot.slane %v174_v49, %v410_v27 }
 0x2a8   :  { %v218_v53 = vpop.permute.xlu0 %217 }
 0x2a9   :  { %v177_v50 = vpop.permute.xlu1 %176  ;;  %v226_v57 = vrot.slane %v218_v53, %v410_v27 }
 0x2aa   :  { %v185_v52 = vrot.slane %v177_v50, %v410_v27 }
 0x2ac   :  { %v186_v54 = vsel %vm146_vm2, %v185_v52, %v181_v51 }
 0x2ad   :  { %v215_v55 = vpop.permute.xlu1 %214  ;;  %v188_v56 = vsel %vm149_vm3, %v186_v54, 0.0 }
 0x2ae   :  { %v222_v58 = vrot.slane %v215_v55, %v410_v27  ;;  %189 = vadd.xlane.f32.xlu1 %v188_v56 }
 0x2b0   :  { %v227_v59 = vsel %vm146_vm2, %v226_v57, %v222_v58 }
 0x2b1   :  { %v229_v60 = vsel %vm149_vm3, %v227_v59, 0.0 }
 0x2b2   :  { %230 = vadd.xlane.f32.xlu0 %v229_v60 }
 0x33b   :  { %v190_v61 = vpop.xlane.xlu1 %189 }
 0x33c   :  { %v232_v62 = vmul.f32 1e-13, %v190_v61 }
 0x33f   :  { %v231_v63 = vpop.xlane.xlu0 %230 }
 0x340   :  { %v233_v0 = vadd.f32 %v232_v62, %v231_v63 }
 0x342   :  { %v238_v1 = vrot.slane %v233_v0, %v156_v33  ;;  %v242_v2 = vrot.slane %v233_v0, %v160_v22 }
 0x344   :  { %323 = vrcp.f32 %v238_v1 }
 0x345   :  { %325 = vrcp.f32 %v242_v2 }
 0x34e   :  { %v324_v3 = vpop.eup %323 }
 0x34f   :  { %v326_v4 = vpop.eup %325  ;;  %v246_v5 = vmul.f32 %v324_v3, %v209_v48 }
 0x350   :  { %v248_v6 = vmul.f32 %v326_v4, %v210_v46 }
 0x351   :  { %252 = vperm.xlu0 %314, %v246_v5  }
 0x352   :  { %255 = vperm.xlu1 %313, %v248_v6  }
 0x3d0   :  { %v253_v7 = vpop.permute.xlu0 %252 }
 0x3d1   :  { %v256_v8 = vpop.permute.xlu1 %255  ;;  %v260_v9 = vrot.slane %v253_v7, %v410_v27 }
 0x3d2   :  { %v264_v10 = vrot.slane %v256_v8, %v410_v27 }
 0x3d4   :  { %v265_v11 = vsel %vm146_vm2, %v264_v10, %v260_v9 }
 0x3d5   :  { %267 = vst.msk [vmem:[#allocation2] sm:$0x3] %vm149_vm3, %v265_v11 }
 0x3d6   :  { %338 = shalt.err (!%p335_p4)
}
 0x3d7   :  { %s339_s11 = scalar_lea.hbm %s445_s5, 32 }
 0x3d8   :  { %p340_p5 = scmp.ne.s32.totalorder %s445_s5, %s339_s11  ;;  %p343_p6 = scmp.lt.u32.totalorder %s339_s11, %s445_s5 }
 0x3da   :  { %p345_p7 = pnand %p343_p6, %p340_p5 }
 0x3dc   :  { %348 = shalt.err (!%p345_p7)
}
 0x3dd   :  { %277 = dma.vmem_to_hbm [thread:$0]  %s275_s4, 32, %s445_s5, [#allocation3]  }
 0x3de   :  { %349 = dma.done.wait [#allocation3], 32  }
 0x3df   :  { %350 = vsyncadd [#allocation3], 4294967264 }
 0x3e0   :  { %281 = vsyncpa [#allocation3], 1 }

</bundles_post_ra>
